<compile_context>
chip_gen: v7x
topology: tpu7x:2x2x1
jax: 0.10.0
libtpu: 0.0.40
codegen_flags: <defaults>
</compile_context>

<pallas_src>
import math
import functools

import jax
import jax.numpy as jnp
from jax.experimental import pallas as pl
from jax.experimental.pallas import tpu as pltpu


# ------------------------------- helpers ----------------------------------- #

def _round_up(x, m):
    return ((x + m - 1) // m) * m


def _pick_tile(n_pad, cap):
    # largest power-of-two multiple of 128 that divides n_pad and is <= cap
    t = 128
    while t * 2 <= cap and n_pad % (t * 2) == 0:
        t *= 2
    return t


# ------------------------------ Pallas kernel ------------------------------- #

def gcniii_layer_kernel(adj_ref, norm_src_ref, norm_dst_ref, feat_src_ref,
                        feat0_ref, feat_res_ref, w_ref, o_ref, acc_ref,
                        *, alpha, beta, res, mapping, residual):
    # grid = (i: dst-row tiles, k: src tiles); acc accumulates A[i,k] @ (D^-1/2 feat)[k].
    k = pl.program_id(1)

    @pl.when(k == 0)
    def _():
        acc_ref[...] = jnp.zeros_like(acc_ref)

    # bf16 MXU operands, f32 accumulation; adjacency tile is already bf16 (exact 0/1).
    h_scaled = (feat_src_ref[...] * norm_src_ref[...]).astype(jnp.bfloat16)
    acc_ref[...] += jnp.dot(adj_ref[...], h_scaled, preferred_element_type=jnp.float32)

    @pl.when(k == pl.num_programs(1) - 1)
    def _():
        agg = acc_ref[...] * norm_dst_ref[...]                      # dst-side D^-1/2
        if res:
            feat_sum = (1.0 - alpha) * agg + alpha * feat0_ref[...]  # initial residual
        else:
            feat_sum = agg
        if mapping:
            mapped = jnp.dot(feat_sum, w_ref[...], preferred_element_type=jnp.float32)
            rst = (1.0 - beta) * feat_sum + beta * mapped            # identity mapping
        else:
            rst = feat_sum
        if residual:
            rst = rst + feat_res_ref[...]                            # layer residual
        o_ref[...] = rst.astype(o_ref.dtype)


# ------------------------------ layer wrapper ------------------------------- #

def gcniii_layer_forward(weight, adj, feat, feat_0, *, alpha, lamda, layer,
                         res=True, mapping=True, residual=True,
                         allow_zero_in_degree=False):
    f32, bf16 = jnp.float32, jnp.bfloat16
    N, F = feat.shape
    assert weight.shape == (F, F), "GCNIIILayer with mapping/residual requires in_size == out_size"
    assert feat_0.shape == (N, F)

    if not allow_zero_in_degree:
        # Host-side equivalent of the DGLError check (self-loops are expected on the input graph).
        if bool(jnp.any(jnp.sum(adj, axis=1) == 0)):
            raise ValueError("There are 0-in-degree nodes in the graph; add self-loops or set "
                             "allow_zero_in_degree=True.")

    beta = math.log(lamda / layer + 1.0)

    # Lane/sublane-friendly padded on-device layout (zero-padded; sliced back at the end).
    N_pad = _round_up(N, 128)
    F_pad = _round_up(F, 128)

    def pad2(x, r, c):
        x = jnp.asarray(x, f32)
        return jnp.pad(x, ((0, r - x.shape[0]), (0, c - x.shape[1])))

    adj_p = pad2(adj, N_pad, N_pad)
    feat_p = pad2(feat, N_pad, F_pad)
    feat0_p = pad2(feat_0, N_pad, F_pad)
    w_p = pad2(weight, F_pad, F_pad)

    # Single bf16 adjacency (exact for 0/1); D^-1/2 scalings applied in-kernel.
    adj_b = adj_p.astype(bf16)
    deg = jnp.maximum(jnp.asarray(adj, f32).sum(axis=1), 1.0)       # in-degree, clamp(min=1)
    norm = jax.lax.rsqrt(deg)
    norm_p = jnp.pad(norm, (0, N_pad - N), constant_values=1.0).reshape(N_pad, 1)

    # Tile sizes: divide N_pad, multiples of 128, comfortably inside scoped VMEM on v5e/v6e/v7x.
    TM = _pick_tile(N_pad, 256)
    TK = _pick_tile(N_pad, 512)
    n_i, n_k = N_pad // TM, N_pad // TK

    kern = functools.partial(gcniii_layer_kernel,
                             alpha=float(alpha), beta=float(beta),
                             res=bool(res), mapping=bool(mapping), residual=bool(residual))

    flops = 2 * N_pad * N_pad * F_pad + (2 * N_pad * F_pad * F_pad if mapping else 0)
    bytes_accessed = (2 * N_pad * N_pad                       # bf16 adjacency
                      + 4 * (3 * N_pad * F_pad                # feat (src), feat_0, residual feat
                             + F_pad * F_pad                  # W
                             + 2 * N_pad                      # norms
                             + N_pad * F_pad))                # output

    out_p = pl.pallas_call(
        kern,
        out_shape=jax.ShapeDtypeStruct((N_pad, F_pad), f32),
        grid_spec=pltpu.PrefetchScalarGridSpec(
            num_scalar_prefetch=0,
            grid=(n_i, n_k),
            in_specs=[
                pl.BlockSpec((TM, TK), lambda i, k: (i, k)),        # A[dst, src] tile (bf16)
                pl.BlockSpec((TK, 1), lambda i, k: (k, 0)),         # D^-1/2 (src rows)
                pl.BlockSpec((TM, 1), lambda i, k: (i, 0)),         # D^-1/2 (dst rows)
                pl.BlockSpec((TK, F_pad), lambda i, k: (k, 0)),     # feat (src rows)
                pl.BlockSpec((TM, F_pad), lambda i, k: (i, 0)),     # feat_0 (resident along k)
                pl.BlockSpec((TM, F_pad), lambda i, k: (i, 0)),     # feat (layer residual)
                pl.BlockSpec((F_pad, F_pad), lambda i, k: (0, 0)),  # W (resident along grid)
            ],
            out_specs=pl.BlockSpec((TM, F_pad), lambda i, k: (i, 0)),
            scratch_shapes=[pltpu.VMEM((TM, F_pad), jnp.float32)],
        ),
        compiler_params=pltpu.CompilerParams(
            dimension_semantics=("parallel", "arbitrary")),
        cost_estimate=pl.CostEstimate(flops=flops, transcendentals=0,
                                      bytes_accessed=bytes_accessed),
    )(adj_b, norm_p, norm_p, feat_p, feat0_p, feat_p, w_p)

    return out_p[:N, :F]


# --------------------------- pure-JAX reference ----------------------------- #

def gcniii_layer_reference(weight, adj, feat, feat_0, *, alpha, lamda, layer,
                           res=True, mapping=True, residual=True):
    beta = math.log(lamda / layer + 1.0)
    deg = jnp.maximum(adj.sum(axis=1), 1.0)
    norm = deg ** -0.5
    h = feat * norm[:, None]
    h = adj @ h
    h = h * norm[:, None]
    feat_sum = (1.0 - alpha) * h + alpha * feat_0 if res else h
    if mapping:
        rst = (1.0 - beta) * feat_sum + beta * (feat_sum @ weight)
    else:
        rst = feat_sum
    if residual:
        rst = rst + feat
    return rst


# ----------------------------------- main ------------------------------------ #

if __name__ == "__main__":
    N = 80          # nodes
    F = 32          # in_size == out_size (hidden width)
    alpha, lamda, layer_idx = 0.1, 0.5, 2

    key = jax.random.PRNGKey(0)
    k_adj, k_feat, k_feat0, k_w = jax.random.split(key, 4)

    adj = (jax.random.uniform(k_adj, (N, N)) < 0.2).astype(jnp.float32)
    adj = jnp.maximum(adj, jnp.eye(N, dtype=jnp.float32))   # self-loops -> no 0-in-degree nodes

    feat = jax.random.normal(k_feat, (N, F), dtype=jnp.float32)
    feat_0 = jax.random.normal(k_feat0, (N, F), dtype=jnp.float32)
    std = 1.0 / math.sqrt(F)
    weight = jax.random.uniform(k_w, (F, F), dtype=jnp.float32, minval=-std, maxval=std)
    # TODO(synk): DropEdge / Dropout during training are not modeled (eval-mode forward).

    # Full GCNII configuration: res=True, mapping=True, residual=True.
    out = gcniii_layer_forward(weight, adj, feat, feat_0,
                               alpha=alpha, lamda=lamda, layer=layer_idx,
                               res=True, mapping=True, residual=True)
    out = jax.block_until_ready(out)
    ref = gcniii_layer_reference(weight, adj, feat, feat_0,
                                 alpha=alpha, lamda=lamda, layer=layer_idx,
                                 res=True, mapping=True, residual=True)
    assert out.shape == (N, F)
    assert jnp.allclose(out, ref, atol=2e-2, rtol=2e-2)

    # Plain normalized-aggregation configuration (res=False, mapping=False, residual=False).
    out2 = gcniii_layer_forward(weight, adj, feat, feat_0,
                                alpha=alpha, lamda=lamda, layer=layer_idx,
                                res=False, mapping=False, residual=False)
    out2 = jax.block_until_ready(out2)
    ref2 = gcniii_layer_reference(weight, adj, feat, feat_0,
                                  alpha=alpha, lamda=lamda, layer=layer_idx,
                                  res=False, mapping=False, residual=False)
    assert jnp.allclose(out2, ref2, atol=2e-2, rtol=2e-2)

    print("KERNEL_OK")
</pallas_src>

<mosaic_0001>
module attributes {stable_mosaic.version = 11 : i64} {
  func.func @gcniii_layer_kernel(%arg0: i32, %arg1: i32, %arg2: memref<128x128xbf16, #tpu.memory_space<vmem>>, %arg3: memref<128x1xf32, #tpu.memory_space<vmem>>, %arg4: memref<128x1xf32, #tpu.memory_space<vmem>>, %arg5: memref<128x128xf32, #tpu.memory_space<vmem>>, %arg6: memref<128x128xf32, #tpu.memory_space<vmem>>, %arg7: memref<128x128xf32, #tpu.memory_space<vmem>>, %arg8: memref<128x128xf32, #tpu.memory_space<vmem>>, %arg9: memref<128x128xf32, #tpu.memory_space<vmem>>, %arg10: memref<128x128xf32, #tpu.memory_space<vmem>>) attributes {dimension_semantics = [#tpu.dimension_semantics<parallel>, #tpu.dimension_semantics<arbitrary>], iteration_bounds = array<i64: 1, 1>, scalar_prefetch = 0 : i64, scratch_operands = 1 : i64, tpu.core_type = #tpu.core_type<tc>, window_params = [{transform_indices = @transform_0, window_bounds = array<i64: 128, 128>}, {transform_indices = @transform_1, window_bounds = array<i64: 128, 1>}, {transform_indices = @transform_2, window_bounds = array<i64: 128, 1>}, {transform_indices = @transform_3, window_bounds = array<i64: 128, 128>}, {transform_indices = @transform_4, window_bounds = array<i64: 128, 128>}, {transform_indices = @transform_5, window_bounds = array<i64: 128, 128>}, {pipeline_mode = #tpu.pipeline_mode<synchronous>, transform_indices = @transform_6, window_bounds = array<i64: 128, 128>}, {transform_indices = @transform_7, window_bounds = array<i64: 128, 128>}]} {
    %c0_i32 = arith.constant 0 : i32
    %0 = arith.cmpi eq, %arg1, %c0_i32 : i32
    %1 = arith.extui %0 : i1 to i32
    %c0_i32_0 = arith.constant 0 : i32
    %2 = arith.cmpi ne, %1, %c0_i32_0 : i32
    scf.if %2 {
      %cst_12 = arith.constant 0.000000e+00 : f32
      %16 = vector.broadcast %cst_12 : f32 to vector<128x128xf32>
      %c0_13 = arith.constant 0 : index
      %c0_14 = arith.constant 0 : index
      %17 = vector.load %arg10[%c0_13, %c0_14] : memref<128x128xf32, #tpu.memory_space<vmem>>, vector<128x128xf32>
      tpu.vector_store %arg10[%c0_13, %c0_14], %16 {strides = array<i32>} : memref<128x128xf32, #tpu.memory_space<vmem>>, vector<128x128xf32>,
    } else {
    }
    %c0 = arith.constant 0 : index
    %c0_1 = arith.constant 0 : index
    %3 = vector.load %arg5[%c0, %c0_1] : memref<128x128xf32, #tpu.memory_space<vmem>>, vector<128x128xf32>
    %c0_2 = arith.constant 0 : index
    %c0_3 = arith.constant 0 : index
    %4 = vector.load %arg3[%c0_2, %c0_3] : memref<128x1xf32, #tpu.memory_space<vmem>>, vector<128x1xf32>
    %5 = vector.broadcast %4 : vector<128x1xf32> to vector<128x128xf32>
    %6 = arith.mulf %3, %5 : vector<128x128xf32>
    %7 = arith.truncf %6 : vector<128x128xf32> to vector<128x128xbf16>
    %c0_4 = arith.constant 0 : index
    %c0_5 = arith.constant 0 : index
    %8 = vector.load %arg10[%c0_4, %c0_5] : memref<128x128xf32, #tpu.memory_space<vmem>>, vector<128x128xf32>
    %c0_6 = arith.constant 0 : index
    %c0_7 = arith.constant 0 : index
    %9 = vector.load %arg2[%c0_6, %c0_7] : memref<128x128xbf16, #tpu.memory_space<vmem>>, vector<128x128xbf16>
    %cst = arith.constant dense<0.000000e+00> : vector<128x128xf32>
    %10 = tpu.matmul %9, %7, %cst {dimension_numbers = #tpu.dot_dimension_numbers<[1], [0], [0], [1], [0, 0, 1, 1], [], []>} : vector<128x128xbf16>, vector<128x128xbf16>, vector<128x128xf32> -> vector<128x128xf32>
    %11 = arith.addf %8, %10 : vector<128x128xf32>
    %c0_8 = arith.constant 0 : index
    %c0_9 = arith.constant 0 : index
    %12 = vector.load %arg10[%c0_8, %c0_9] : memref<128x128xf32, #tpu.memory_space<vmem>>, vector<128x128xf32>
    tpu.vector_store %arg10[%c0_8, %c0_9], %11 {strides = array<i32>} : memref<128x128xf32, #tpu.memory_space<vmem>>, vector<128x128xf32>,
    %c0_i32_10 = arith.constant 0 : i32
    %13 = arith.cmpi eq, %arg1, %c0_i32_10 : i32
    %14 = arith.extui %13 : i1 to i32
    %c0_i32_11 = arith.constant 0 : i32
    %15 = arith.cmpi ne, %14, %c0_i32_11 : i32
    scf.if %15 {
      %c0_12 = arith.constant 0 : index
      %c0_13 = arith.constant 0 : index
      %16 = vector.load %arg10[%c0_12, %c0_13] : memref<128x128xf32, #tpu.memory_space<vmem>>, vector<128x128xf32>
      %c0_14 = arith.constant 0 : index
      %c0_15 = arith.constant 0 : index
      %17 = vector.load %arg4[%c0_14, %c0_15] : memref<128x1xf32, #tpu.memory_space<vmem>>, vector<128x1xf32>
      %18 = vector.broadcast %17 : vector<128x1xf32> to vector<128x128xf32>
      %19 = arith.mulf %16, %18 : vector<128x128xf32>
      %cst_16 = arith.constant 0.899999976 : f32
      %20 = vector.broadcast %cst_16 : f32 to vector<128x128xf32>
      %21 = arith.mulf %20, %19 : vector<128x128xf32>
      %c0_17 = arith.constant 0 : index
      %c0_18 = arith.constant 0 : index
      %22 = vector.load %arg6[%c0_17, %c0_18] : memref<128x128xf32, #tpu.memory_space<vmem>>, vector<128x128xf32>
      %cst_19 = arith.constant 1.000000e-01 : f32
      %23 = vector.broadcast %cst_19 : f32 to vector<128x128xf32>
      %24 = arith.mulf %23, %22 : vector<128x128xf32>
      %25 = arith.addf %21, %24 : vector<128x128xf32>
      %c0_20 = arith.constant 0 : index
      %c0_21 = arith.constant 0 : index
      %26 = vector.load %arg8[%c0_20, %c0_21] : memref<128x128xf32, #tpu.memory_space<vmem>>, vector<128x128xf32>
      %cst_22 = arith.constant dense<0.000000e+00> : vector<128x128xf32>
      %27 = tpu.matmul %25, %26, %cst_22 {dimension_numbers = #tpu.dot_dimension_numbers<[1], [0], [0], [1], [0, 0, 1, 1], [], []>} : vector<128x128xf32>, vector<128x128xf32>, vector<128x128xf32> -> vector<128x128xf32>
      %cst_23 = arith.constant 0.776856422 : f32
      %28 = vector.broadcast %cst_23 : f32 to vector<128x128xf32>
      %29 = arith.mulf %28, %25 : vector<128x128xf32>
      %cst_24 = arith.constant 0.223143548 : f32
      %30 = vector.broadcast %cst_24 : f32 to vector<128x128xf32>
      %31 = arith.mulf %30, %27 : vector<128x128xf32>
      %32 = arith.addf %29, %31 : vector<128x128xf32>
      %c0_25 = arith.constant 0 : index
      %c0_26 = arith.constant 0 : index
      %33 = vector.load %arg7[%c0_25, %c0_26] : memref<128x128xf32, #tpu.memory_space<vmem>>, vector<128x128xf32>
      %34 = arith.addf %32, %33 : vector<128x128xf32>
      %c0_27 = arith.constant 0 : index
      %c0_28 = arith.constant 0 : index
      %35 = vector.load %arg9[%c0_27, %c0_28] : memref<128x128xf32, #tpu.memory_space<vmem>>, vector<128x128xf32>
      tpu.vector_store %arg9[%c0_27, %c0_28], %34 {strides = array<i32>} : memref<128x128xf32, #tpu.memory_space<vmem>>, vector<128x128xf32>,
    } else {
    }
    return
  }
  func.func @transform_0(%arg0: i32, %arg1: i32) -> (i32, i32) {
    %c0_i32 = arith.constant 0 : i32
    return %arg0, %arg1 : i32, i32
  }
  func.func @transform_1(%arg0: i32, %arg1: i32) -> (i32, i32) {
    %c0_i32 = arith.constant 0 : i32
    %c0_i32_0 = arith.constant 0 : i32
    return %arg1, %c0_i32 : i32, i32
  }
  func.func @transform_2(%arg0: i32, %arg1: i32) -> (i32, i32) {
    %c0_i32 = arith.constant 0 : i32
    %c0_i32_0 = arith.constant 0 : i32
    return %arg0, %c0_i32 : i32, i32
  }
  func.func @transform_3(%arg0: i32, %arg1: i32) -> (i32, i32) {
    %c0_i32 = arith.constant 0 : i32
    %c0_i32_0 = arith.constant 0 : i32
    return %arg1, %c0_i32 : i32, i32
  }
  func.func @transform_4(%arg0: i32, %arg1: i32) -> (i32, i32) {
    %c0_i32 = arith.constant 0 : i32
    %c0_i32_0 = arith.constant 0 : i32
    return %arg0, %c0_i32 : i32, i32
  }
  func.func @transform_5(%arg0: i32, %arg1: i32) -> (i32, i32) {
    %c0_i32 = arith.constant 0 : i32
    %c0_i32_0 = arith.constant 0 : i32
    return %arg0, %c0_i32 : i32, i32
  }
  func.func @transform_6(%arg0: i32, %arg1: i32) -> (i32, i32) {
    %c0_i32 = arith.constant 0 : i32
    %c0_i32_0 = arith.constant 0 : i32
    %c0_i32_1 = arith.constant 0 : i32
    return %c0_i32, %c0_i32_0 : i32, i32
  }
  func.func @transform_7(%arg0: i32, %arg1: i32) -> (i32, i32) {
    %c0_i32 = arith.constant 0 : i32
    %c0_i32_0 = arith.constant 0 : i32
    return %arg0, %c0_i32 : i32, i32
  }
}

</mosaic_0001>

<bundles_post_ra>
// kernel: tpu_custom_call.1
= control target key start
LH: loop header
LB: loop body
LE: loop exit
PB: predicated region body
PF: predicated region fallthrough
CT: control target
= control target key end

     0   :  { %12 = vsyncpa [#allocation4], 0  ;;  %s1555_s0 = inlined_call_operand.hbm [shape: bf16[128,128], index: 0, kind: input, shape index: {}]   ;;  %s1556_s1 = inlined_call_operand.vmem [shape: f32[128,1], index: 1, kind: input, shape index: {}]   ;;  %s1557_s2 = inlined_call_operand.vmem [shape: f32[128,1], index: 2, kind: input, shape index: {}]   ;;  %s1558_s3 = inlined_call_operand.vmem [shape: f32[128,128], index: 3, kind: input, shape index: {}]   ;;  %s1559_s4 = inlined_call_operand.vmem [shape: f32[128,128], index: 4, kind: input, shape index: {}]   ;;  %s1560_s5 = inlined_call_operand.hbm [shape: f32[128,128], index: 5, kind: input, shape index: {}]   ;;  %s1561_s6 = inlined_call_operand.hbm [shape: f32[128,128], index: 6, kind: input, shape index: {}]   ;;  %s1562_s7 = inlined_call_operand.hbm [shape: f32[128,128], index: 7, kind: output, shape index: {}]  }
   0x1   :  { %13 = vsyncpa [#allocation7], 0 }
   0x2   :  { %14 = vsyncpa [#allocation5], 0  ;;  %s1193_s24 = smov [#allocation6]   ;;  %s1099_s28 = scalar_lea.hbm %s1560_s5, 2048 }
   0x3   :  { %s40_s25 = sshll.u32 %s1193_s24, 4  ;;  %p1100_p0 = scmp.ne.s32.totalorder %s1560_s5, %s1099_s28  ;;  %s41_s25 = int_to_ptr.vmem [resolvable:$true] %s40_s25 }
   0x4   :  { %p1103_p1 = scmp.lt.u32.totalorder %s1099_s28, %s1560_s5 }
   0x6   :  { %p1105_p2 = pnand %p1103_p1, %p1100_p0 }
   0x8   :  { %1108 = shalt.err (!%p1105_p2)
}
   0x9   :  { %s1109_s10 = scalar_lea.vmem %s41_s25, 2048  ;;  %p1114_p4 = scmp.lt.s32.totalorder %s41_s25, %s41_s25 }
   0xa   :  { %p1110_p3 = scmp.ne.s32.totalorder %s41_s25, %s1109_s10  ;;  %p1115_p5 = scmp.lt.s32.totalorder %s1109_s10, %s1109_s10 }
   0xc   :  { %p1116_p6 = por %p1115_p5, %p1114_p4 }
   0xe   :  { %p1117_p7 = pnand %p1116_p6, %p1110_p3 }
  0x10   :  { %1120 = shalt.err (!%p1117_p7)
}
  0x11   :  { %s1194_s11 = smov 128   ;;  %s1195_s12 = smov 8  }
  0x12   :  { %46 = dma.hbm_to_vmem [thread:$0]  %s1560_s5, 2048, %s41_s25, [#allocation7], %s1194_s11, %s1194_s11, %s1195_s12  }
  0x13   :  { %s1196_s15 = smov [#allocation3]   ;;  %s1121_s19 = scalar_lea.hbm %s1555_s0, 1024 }
  0x14   :  { %s20_s16 = sshll.u32 %s1196_s15, 4  ;;  %p1122_p8 = scmp.ne.s32.totalorder %s1555_s0, %s1121_s19  ;;  %s21_s16 = int_to_ptr.vmem [resolvable:$true] %s20_s16 }
  0x15   :  { %p1125_p9 = scmp.lt.u32.totalorder %s1121_s19, %s1555_s0 }
  0x17   :  { %p1127_p10 = pnand %p1125_p9, %p1122_p8 }
  0x19   :  { %1130 = shalt.err (!%p1127_p10)
}
  0x1a   :  { %s1131_s24 = scalar_lea.vmem %s21_s16, 1024  ;;  %p1136_p12 = scmp.lt.s32.totalorder %s21_s16, %s21_s16 }
  0x1b   :  { %p1132_p11 = scmp.ne.s32.totalorder %s21_s16, %s1131_s24  ;;  %p1137_p13 = scmp.lt.s32.totalorder %s1131_s24, %s1131_s24 }
  0x1d   :  { %p1138_p0 = por %p1137_p13, %p1136_p12 }
  0x1f   :  { %p1139_p1 = pnand %p1138_p0, %p1132_p11 }
  0x21   :  { %1142 = shalt.err (!%p1139_p1)
}
  0x22   :  { %s1197_s5 = smov 64   ;;  %s1198_s25 = smov 4  }
  0x23   :  { %26 = dma.hbm_to_vmem [thread:$0]  %s1555_s0, 1024, %s21_s16, [#allocation4], %s1197_s5, %s1197_s5, %s1198_s25  }
  0x24   :  { %s1199_s28 = smov [#allocation8]   ;;  %s1143_s9 = scalar_lea.hbm %s1561_s6, 2048 }
  0x25   :  { %s52_s29 = sshll.u32 %s1199_s28, 4  ;;  %p1144_p2 = scmp.ne.s32.totalorder %s1561_s6, %s1143_s9  ;;  %s53_s29 = int_to_ptr.vmem [resolvable:$true] %s52_s29 }
  0x26   :  { %p1147_p3 = scmp.lt.u32.totalorder %s1143_s9, %s1561_s6 }
  0x28   :  { %p1149_p4 = pnand %p1147_p3, %p1144_p2 }
  0x2a   :  { %1152 = shalt.err (!%p1149_p4)
}
  0x2b   :  { %s1153_s17 = scalar_lea.vmem %s53_s29, 2048  ;;  %p1158_p6 = scmp.lt.s32.totalorder %s53_s29, %s53_s29 }
  0x2c   :  { %p1154_p5 = scmp.ne.s32.totalorder %s53_s29, %s1153_s17  ;;  %p1159_p7 = scmp.lt.s32.totalorder %s1153_s17, %s1153_s17 }
  0x2e   :  { %p1160_p8 = por %p1159_p7, %p1158_p6 }
  0x30   :  { %p1161_p9 = pnand %p1160_p8, %p1154_p5 }
  0x32   :  { %1164 = shalt.err (!%p1161_p9)
}
  0x33   :  { %58 = dma.hbm_to_vmem [thread:$0]  %s1561_s6, 2048, %s53_s29, [#allocation7], %s1194_s11, %s1194_s11, %s1195_s12  }
  0x34   :  { %1187 = dma.done.wait [#allocation4], 1024  }
  0x35   :  { %1188 = vsyncadd [#allocation4], 4294966272 }
  0x36   :  { %1189 = dma.done.wait [#allocation7], 4096  }
  0x37   :  { %1190 = vsyncadd [#allocation7], 4294963200  ;;  %v1200_v0 = vmov 0   ;;  %v107_v1 = vld [vmem:[%s1556_s1 + $0x10] sm:$0xff]  ;;  %v105_v2 = vld [vmem:[%s1556_s1] sm:$0xff] }
  0x38   :  { %1090 = vset.pattern.permute.xlu1 %v1200_v0  ;;  %1089 = vset.pattern.permute.xlu0 %v1200_v0  ;;  %v108_v3 = vld [vmem:[%s1556_s1 + $0x18] sm:$0xff]  ;;  %v106_v4 = vld [vmem:[%s1556_s1 + $0x8] sm:$0xff]  ;;  %v109_v6 = vld [vmem:[%s1556_s1 + $0x20] sm:$0xff] }
  0x39   :  { %133 = vperm.xlu1 %1090, %v107_v1   ;;  %123 = vperm.xlu0 %1089, %v105_v2   ;;  %v110_v5 = vld [vmem:[%s1556_s1 + $0x28] sm:$0xff]  ;;  %v112_v7 = vld [vmem:[%s1556_s1 + $0x38] sm:$0xff]  ;;  %v111_v8 = vld [vmem:[%s1556_s1 + $0x30] sm:$0xff] }
  0x3a   :  { %v114_v9 = vld [vmem:[%s1556_s1 + $0x48] sm:$0xff]  ;;  %v113_v10 = vld [vmem:[%s1556_s1 + $0x40] sm:$0xff]  ;;  %v116_v11 = vld [vmem:[%s1556_s1 + $0x58] sm:$0xff] }
  0x3b   :  { %v115_v12 = vld [vmem:[%s1556_s1 + $0x50] sm:$0xff]  ;;  %v118_v13 = vld [vmem:[%s1556_s1 + $0x68] sm:$0xff]  ;;  %v117_v14 = vld [vmem:[%s1556_s1 + $0x60] sm:$0xff] }
  0x3c   :  { %v120_v15 = vld [vmem:[%s1556_s1 + $0x78] sm:$0xff]  ;;  %v119_v16 = vld [vmem:[%s1556_s1 + $0x70] sm:$0xff]  ;;  %v454_v17 = vld [vmem:[%s1557_s2 + $0x8] sm:$0xff] }
  0x3d   :  { %138 = vperm.xlu1 %1090, %v108_v3   ;;  %128 = vperm.xlu0 %1089, %v106_v4   ;;  %v453_v18 = vld [vmem:[%s1557_s2] sm:$0xff]  ;;  %v456_v19 = vld [vmem:[%s1557_s2 + $0x18] sm:$0xff]  ;;  %v455_v20 = vld [vmem:[%s1557_s2 + $0x10] sm:$0xff] }
  0x3e   :  { %v458_v21 = vld [vmem:[%s1557_s2 + $0x28] sm:$0xff]  ;;  %v457_v22 = vld [vmem:[%s1557_s2 + $0x20] sm:$0xff]  ;;  %v460_v24 = vld [vmem:[%s1557_s2 + $0x38] sm:$0xff] }
  0x3f   :  { %v1091_v23 = vld [vmem:[#allocation3] sm:$0xff]   ;;  %v459_v25 = vld [vmem:[%s1557_s2 + $0x30] sm:$0xff]  ;;  %v462_v26 = vld [vmem:[%s1557_s2 + $0x48] sm:$0xff] }
  0x40   :  { %976 = vmatprep.mubr.bf16.mxu0 %v1091_v23  ;;  %v461_v27 = vld [vmem:[%s1557_s2 + $0x40] sm:$0xff]  ;;  %v464_v28 = vld [vmem:[%s1557_s2 + $0x58] sm:$0xff]  ;;  %v463_v29 = vld [vmem:[%s1557_s2 + $0x50] sm:$0xff] }
  0x41   :  { %148 = vperm.xlu1 %1090, %v110_v5   ;;  %143 = vperm.xlu0 %1089, %v109_v6   ;;  %v466_v30 = vld [vmem:[%s1557_s2 + $0x68] sm:$0xff]  ;;  %v465_v31 = vld [vmem:[%s1557_s2 + $0x60] sm:$0xff]  ;;  %v468_v32 = vld [vmem:[%s1557_s2 + $0x78] sm:$0xff] }
  0x42   :  { %v467_v33 = vld [vmem:[%s1557_s2 + $0x70] sm:$0xff]  ;;  %v629_v34 = vld [vmem:[#allocation8] sm:$0xff]  ;;  %v630_v35 = vld [vmem:[#allocation8 + $0x8] sm:$0xff] }
  0x43   :  { %v631_v36 = vld [vmem:[#allocation8 + $0x10] sm:$0xff]  ;;  %v1048_v37 = vpack.c.bf16 %v630_v35, %v629_v34  ;;  %v632_v38 = vld [vmem:[#allocation8 + $0x18] sm:$0xff]  ;;  %v633_v40 = vld [vmem:[#allocation8 + $0x20] sm:$0xff] }
  0x44   :  { %v1052_v39 = vpack.c.bf16 %v632_v38, %v631_v36  ;;  %v634_v41 = vld [vmem:[#allocation8 + $0x28] sm:$0xff]  ;;  %v635_v43 = vld [vmem:[#allocation8 + $0x30] sm:$0xff]  ;;  %v636_v44 = vld [vmem:[#allocation8 + $0x38] sm:$0xff] }
  0x45   :  { %158 = vperm.xlu1 %1090, %v112_v7   ;;  %153 = vperm.xlu0 %1089, %v111_v8   ;;  %v1056_v42 = vpack.c.bf16 %v634_v41, %v633_v40  ;;  %v1060_v45 = vpack.c.bf16 %v636_v44, %v635_v43  ;;  %v637_v46 = vld [vmem:[#allocation8 + $0x40] sm:$0xff]  ;;  %v638_v47 = vld [vmem:[#allocation8 + $0x48] sm:$0xff]  ;;  %v639_v49 = vld [vmem:[#allocation8 + $0x50] sm:$0xff] }
  0x46   :  { %1049 = vmatprep.subr.bf16.mxu1 %v1048_v37  ;;  %v1064_v48 = vpack.c.bf16 %v638_v47, %v637_v46  ;;  %v640_v50 = vld [vmem:[#allocation8 + $0x58] sm:$0xff]  ;;  %v91_v54 = vld [vmem:[%s1558_s3 + $0x10] sm:$0xff]  ;;  %v89_v55 = vld [vmem:[%s1558_s3] sm:$0xff] }
  0x47   :  { %1051 = vmatpush3.bf16.msra.mxu1 %v1048_v37  ;;  %v1068_v51 = vpack.c.bf16 %v640_v50, %v639_v49  ;;  %v92_v56 = vld [vmem:[%s1558_s3 + $0x18] sm:$0xff]  ;;  %v90_v57 = vld [vmem:[%s1558_s3 + $0x8] sm:$0xff]  ;;  %v93_v1 = vld [vmem:[%s1558_s3 + $0x20] sm:$0xff] }
  0x48   :  { %1053 = vmatprep.subr.bf16.mxu1 %v1052_v39  ;;  %v94_v0 = vld [vmem:[%s1558_s3 + $0x28] sm:$0xff]  ;;  %v96_v8 = vld [vmem:[%s1558_s3 + $0x38] sm:$0xff]  ;;  %v99_v23 = vld [vmem:[%s1558_s3 + $0x50] sm:$0xff] }
  0x49   :  { %168 = vperm.xlu1 %1090, %v114_v9   ;;  %163 = vperm.xlu0 %1089, %v113_v10   ;;  %v95_v9 = vld [vmem:[%s1558_s3 + $0x30] sm:$0xff]  ;;  %v104_v36 = vld [vmem:[%s1558_s3 + $0x78] sm:$0xff]  ;;  %v1092_v44 = vld [vmem:[#allocation3 + $0x8] sm:$0xff]  }
  0x4a   :  { %v103_v37 = vld [vmem:[%s1558_s3 + $0x70] sm:$0xff]  ;;  %v1094_v46 = vld [vmem:[#allocation3 + $0x18] sm:$0xff]   ;;  %v1095_v47 = vld [vmem:[#allocation3 + $0x20] sm:$0xff]  }
  0x4b   :  { %1055 = vmatpush3.bf16.msra.mxu1 %v1052_v39  ;;  %v1097_v49 = vld [vmem:[#allocation3 + $0x30] sm:$0xff]   ;;  %v1098_v50 = vld [vmem:[#allocation3 + $0x38] sm:$0xff]  }
  0x4c   :  { %1057 = vmatprep.subr.bf16.mxu1 %v1056_v42 }
  0x4d   :  { %178 = vperm.xlu1 %1090, %v116_v11   ;;  %173 = vperm.xlu0 %1089, %v115_v12  }
  0x4f   :  { %1059 = vmatpush3.bf16.msra.mxu1 %v1056_v42 }
  0x50   :  { %1061 = vmatprep.subr.bf16.mxu1 %v1060_v45 }
  0x51   :  { %188 = vperm.xlu1 %1090, %v118_v13   ;;  %183 = vperm.xlu0 %1089, %v117_v14  }
  0x53   :  { %1063 = vmatpush3.bf16.msra.mxu1 %v1060_v45  ;;  %v1093_v45 = vld [vmem:[#allocation3 + $0x10] sm:$0xff]  }
  0x54   :  { %1065 = vmatprep.subr.bf16.mxu1 %v1064_v48 }
  0x55   :  { %198 = vperm.xlu1 %1090, %v120_v15   ;;  %193 = vperm.xlu0 %1089, %v119_v16   ;;  %v98_v15 = vld [vmem:[%s1558_s3 + $0x48] sm:$0xff]  ;;  %v97_v16 = vld [vmem:[%s1558_s3 + $0x40] sm:$0xff] }
  0x57   :  { %1067 = vmatpush3.bf16.msra.mxu1 %v1064_v48  ;;  %v1096_v48 = vld [vmem:[#allocation3 + $0x28] sm:$0xff]  }
  0x58   :  { %1069 = vmatprep.subr.bf16.mxu1 %v1068_v51 }
  0x59   :  { %476 = vperm.xlu1 %1090, %v454_v17   ;;  %471 = vperm.xlu0 %1089, %v453_v18  }
  0x5b   :  { %1071 = vmatpush3.bf16.msra.mxu1 %v1068_v51  ;;  %v641_v51 = vld [vmem:[#allocation8 + $0x60] sm:$0xff] }
  0x5d   :  { %486 = vperm.xlu1 %1090, %v456_v19   ;;  %481 = vperm.xlu0 %1089, %v455_v20  }
  0x61   :  { %496 = vperm.xlu1 %1090, %v458_v21   ;;  %491 = vperm.xlu0 %1089, %v457_v22   ;;  %v100_v22 = vld [vmem:[%s1558_s3 + $0x58] sm:$0xff] }
  0x65   :  { %506 = vperm.xlu1 %1090, %v460_v24   ;;  %501 = vperm.xlu0 %1089, %v459_v25  }
  0x69   :  { %516 = vperm.xlu1 %1090, %v462_v26   ;;  %511 = vperm.xlu0 %1089, %v461_v27  }
  0x6d   :  { %526 = vperm.xlu1 %1090, %v464_v28   ;;  %521 = vperm.xlu0 %1089, %v463_v29   ;;  %v102_v29 = vld [vmem:[%s1558_s3 + $0x68] sm:$0xff] }
  0x71   :  { %536 = vperm.xlu1 %1090, %v466_v30   ;;  %531 = vperm.xlu0 %1089, %v465_v31   ;;  %v101_v30 = vld [vmem:[%s1558_s3 + $0x60] sm:$0xff] }
  0x75   :  { %546 = vperm.xlu1 %1090, %v468_v32   ;;  %541 = vperm.xlu0 %1089, %v467_v33  }
  0xb8   :  { %v134_v52 = vpop.permute.xlu1 %133  ;;  %v124_v53 = vpop.permute.xlu0 %123 }
  0xb9   :  { %v203_v60 = vmul.f32 %v134_v52, %v91_v54  ;;  %v201_v61 = vmul.f32 %v124_v53, %v89_v55  ;;  %v642_v52 = vld [vmem:[#allocation8 + $0x68] sm:$0xff]  ;;  %v643_v54 = vld [vmem:[#allocation8 + $0x70] sm:$0xff]  ;;  %v644_v55 = vld [vmem:[#allocation8 + $0x78] sm:$0xff] }
  0xba   :  { %v1072_v53 = vpack.c.bf16 %v642_v52, %v641_v51 }
  0xbc   :  { %v139_v58 = vpop.permute.xlu1 %138  ;;  %v129_v59 = vpop.permute.xlu0 %128  ;;  %1073 = vmatprep.subr.bf16.mxu1 %v1072_v53 }
  0xbd   :  { %v204_v62 = vmul.f32 %v139_v58, %v92_v56  ;;  %v202_v63 = vmul.f32 %v129_v59, %v90_v57  ;;  %1075 = vmatpush3.bf16.msra.mxu1 %v1072_v53  ;;  %v1076_v56 = vpack.c.bf16 %v644_v55, %v643_v54  ;;  %v590_v53 = vld [vmem:[%s1559_s4 + $0x48] sm:$0xff] }
  0xbf   :  { %v217_v2 = vpack.c.bf16 %v202_v63, %v201_v61  ;;  %v218_v5 = vpack.c.bf16 %v204_v62, %v203_v60  ;;  %1077 = vmatprep.subr.bf16.mxu1 %v1076_v56  ;;  %v581_v63 = vld [vmem:[%s1559_s4] sm:$0xff] }
  0xc0   :  { %v149_v3 = vpop.permute.xlu1 %148  ;;  %v144_v4 = vpop.permute.xlu0 %143 }
  0xc1   :  { %v206_v6 = vmul.f32 %v149_v3, %v94_v0  ;;  %v205_v7 = vmul.f32 %v144_v4, %v93_v1  ;;  %960 = vmatprep.subr.bf16.mxu0 %v217_v2  ;;  %1079 = vmatpush3.bf16.msra.mxu1 %v1076_v56  ;;  %v582_v4 = vld [vmem:[%s1559_s4 + $0x8] sm:$0xff] }
  0xc2   :  { %961 = vmatpush3.bf16.msra.mxu0 %v217_v2 }
  0xc3   :  { %962 = vmatprep.subr.bf16.mxu0 %v218_v5  ;;  %v219_v12 = vpack.c.bf16 %v206_v6, %v205_v7 }
  0xc4   :  { %v159_v10 = vpop.permute.xlu1 %158  ;;  %v154_v11 = vpop.permute.xlu0 %153 }
  0xc5   :  { %v208_v13 = vmul.f32 %v159_v10, %v96_v8  ;;  %v207_v14 = vmul.f32 %v154_v11, %v95_v9  ;;  %v597_v8 = vmul.f32 0.1, %v581_v63  ;;  %v606_v63 = vmul.f32 0.1, %v590_v53 }
  0xc6   :  { %963 = vmatpush3.bf16.msra.mxu0 %v218_v5  ;;  %v583_v5 = vld [vmem:[%s1559_s4 + $0x10] sm:$0xff] }
  0xc7   :  { %964 = vmatprep.subr.bf16.mxu0 %v219_v12  ;;  %v220_v19 = vpack.c.bf16 %v208_v13, %v207_v14  ;;  %v598_v14 = vmul.f32 0.1, %v582_v4 }
  0xc8   :  { %v169_v17 = vpop.permute.xlu1 %168  ;;  %v164_v18 = vpop.permute.xlu0 %163 }
  0xc9   :  { %v210_v20 = vmul.f32 %v169_v17, %v98_v15  ;;  %v209_v21 = vmul.f32 %v164_v18, %v97_v16  ;;  %v599_v16 = vmul.f32 0.1, %v583_v5  ;;  %v584_v17 = vld [vmem:[%s1559_s4 + $0x18] sm:$0xff] }
  0xca   :  { %965 = vmatpush3.bf16.msra.mxu0 %v219_v12 }
  0xcb   :  { %966 = vmatprep.subr.bf16.mxu0 %v220_v19  ;;  %v221_v26 = vpack.c.bf16 %v210_v20, %v209_v21  ;;  %v585_v21 = vld [vmem:[%s1559_s4 + $0x20] sm:$0xff] }
  0xcc   :  { %v179_v24 = vpop.permute.xlu1 %178  ;;  %v174_v25 = vpop.permute.xlu0 %173 }
  0xcd   :  { %v212_v27 = vmul.f32 %v179_v24, %v100_v22  ;;  %v211_v28 = vmul.f32 %v174_v25, %v99_v23  ;;  %v600_v23 = vmul.f32 0.1, %v584_v17 }
  0xce   :  { %967 = vmatpush3.bf16.msra.mxu0 %v220_v19 }
  0xcf   :  { %968 = vmatprep.subr.bf16.mxu0 %v221_v26  ;;  %v222_v33 = vpack.c.bf16 %v212_v27, %v211_v28 }
  0xd0   :  { %v189_v31 = vpop.permute.xlu1 %188  ;;  %v184_v32 = vpop.permute.xlu0 %183 }
  0xd1   :  { %v214_v34 = vmul.f32 %v189_v31, %v102_v29  ;;  %v213_v35 = vmul.f32 %v184_v32, %v101_v30  ;;  %v587_v31 = vld [vmem:[%s1559_s4 + $0x30] sm:$0xff] }
  0xd2   :  { %969 = vmatpush3.bf16.msra.mxu0 %v221_v26  ;;  %v586_v26 = vld [vmem:[%s1559_s4 + $0x28] sm:$0xff] }
  0xd3   :  { %970 = vmatprep.subr.bf16.mxu0 %v222_v33  ;;  %v223_v40 = vpack.c.bf16 %v214_v34, %v213_v35 }
  0xd4   :  { %v199_v38 = vpop.permute.xlu1 %198  ;;  %v194_v39 = vpop.permute.xlu0 %193 }
  0xd5   :  { %v216_v41 = vmul.f32 %v199_v38, %v104_v36  ;;  %v215_v42 = vmul.f32 %v194_v39, %v103_v37  ;;  %v602_v36 = vmul.f32 0.1, %v586_v26 }
  0xd6   :  { %971 = vmatpush3.bf16.msra.mxu0 %v222_v33  ;;  %v601_v33 = vmul.f32 0.1, %v585_v21  ;;  %v595_v21 = vld [vmem:[%s1559_s4 + $0x70] sm:$0xff] }
  0xd7   :  { %972 = vmatprep.subr.bf16.mxu0 %v223_v40  ;;  %v224_v43 = vpack.c.bf16 %v216_v41, %v215_v42 }
  0xd8   :  { %v472_v57 = vpop.permute.xlu0 %471  ;;  %v477_v58 = vpop.permute.xlu1 %476 }
  0xda   :  { %973 = vmatpush3.bf16.msra.mxu0 %v223_v40 }
  0xdb   :  { %974 = vmatprep.subr.bf16.mxu0 %v224_v43 }
  0xdc   :  { %v482_v59 = vpop.permute.xlu0 %481  ;;  %v487_v60 = vpop.permute.xlu1 %486 }
  0xde   :  { %975 = vmatpush3.bf16.msra.mxu0 %v224_v43  ;;  %v603_v43 = vmul.f32 0.1, %v587_v31 }
  0xe0   :  { %v492_v61 = vpop.permute.xlu0 %491  ;;  %v497_v62 = vpop.permute.xlu1 %496 }
  0xe1   :  { %977 = vmatmul.mubr.bf16.vlgmr.msra.gmra.mrb[0].mxu0 %v1092_v44  ;;  %v588_v44 = vld [vmem:[%s1559_s4 + $0x38] sm:$0xff] }
  0xe2   :  { %980 = vmatprep.mubr.bf16.mxu0 %v1093_v45 }
  0xe4   :  { %v502_v0 = vpop.permute.xlu0 %501  ;;  %v507_v9 = vpop.permute.xlu1 %506 }
  0xe8   :  { %v512_v18 = vpop.permute.xlu0 %511  ;;  %v517_v27 = vpop.permute.xlu1 %516 }
  0xe9   :  { %981 = vmatmul.mubr.bf16.gmra.mrb[4].mxu0 %v1094_v46 }
  0xea   :  { %984 = vmatprep.mubr.bf16.mxu0 %v1095_v47 }
  0xec   :  { %v522_v37 = vpop.permute.xlu0 %521  ;;  %v527_v47 = vpop.permute.xlu1 %526 }
  0xf0   :  { %v537_v4 = vpop.permute.xlu1 %536 }
  0xf1   :  { %985 = vmatmul.mubr.bf16.gmra.mrb[8].mxu0 %v1096_v48  ;;  %v589_v48 = vld [vmem:[%s1559_s4 + $0x40] sm:$0xff] }
  0xf2   :  { %988 = vmatprep.mubr.bf16.mxu0 %v1097_v49 }
  0xf4   :  { %v547_v26 = vpop.permute.xlu1 %546 }
  0xf9   :  { %989 = vmatmul.mubr.bf16.gmra.mrb[12].mxu0 %v1098_v50  ;;  %v604_v50 = vmul.f32 0.1, %v588_v44 }
 0x1b4   :  { %v978_v1 = vpop.f32.mrb[0].mxu0 }
 0x1b5   :  { %v551_v2 = vmul.f32 %v978_v1, %v482_v59  ;;  %v339_v3 = vpop.f32.mrb[1].mxu0 }
 0x1b6   :  { %v549_v6 = vmul.f32 %v472_v57, %v339_v3  ;;  %v979_v7 = vpop.f32.mrb[2].mxu0  ;;  %v532_v57 = vpop.permute.xlu0 %531 }
 0x1b7   :  { %v342_v10 = vpop.f32.mrb[3].mxu0  ;;  %v552_v12 = vmul.f32 %v979_v7, %v487_v60  ;;  %v567_v15 = vmul.f32 0.9, %v551_v2  ;;  %v605_v60 = vmul.f32 0.1, %v589_v48  ;;  %v592_v7 = vld [vmem:[%s1559_s4 + $0x58] sm:$0xff] }
 0x1b8   :  { %v565_v11 = vmul.f32 0.9, %v549_v6  ;;  %v550_v13 = vmul.f32 %v477_v58, %v342_v10  ;;  %v591_v58 = vld [vmem:[%s1559_s4 + $0x50] sm:$0xff]  ;;  %v593_v10 = vld [vmem:[%s1559_s4 + $0x60] sm:$0xff] }
 0x1b9   :  { %v568_v22 = vmul.f32 0.9, %v552_v12  ;;  %v1451_v28 = vadd.f32 %v599_v16, %v567_v15  ;;  %v607_v6 = vmul.f32 0.1, %v591_v58  ;;  %v594_v16 = vld [vmem:[%s1559_s4 + $0x68] sm:$0xff] }
 0x1ba   :  { %v566_v19 = vmul.f32 0.9, %v550_v13  ;;  %v1440_v20 = vadd.f32 %v597_v8, %v565_v11  ;;  %v542_v11 = vpop.permute.xlu0 %541  ;;  %v608_v13 = vmul.f32 0.1, %v592_v7 }
 0x1bb   :  { %v1458_v38 = vadd.f32 %v600_v23, %v568_v22  ;;  %v609_v23 = vmul.f32 0.1, %v593_v10 }
 0x1bc   :  { %v1445_v24 = vadd.f32 %v598_v14, %v566_v19  ;;  %v982_v25 = vpop.f32.mrb[4].mxu0  ;;  %1024 = vmatprep.mubr.f32.mxu1 %v1440_v20 }
 0x1bd   :  { %v555_v29 = vmul.f32 %v982_v25, %v502_v0  ;;  %v355_v30 = vpop.f32.mrb[5].mxu0 }
 0x1be   :  { %v553_v32 = vmul.f32 %v492_v61, %v355_v30  ;;  %v983_v34 = vpop.f32.mrb[6].mxu0  ;;  %1025 = vmatmul.mubr.f32.vlgmr.msra.gmra.mrb[0].mxu1 %v1445_v24 }
 0x1bf   :  { %v358_v35 = vpop.f32.mrb[7].mxu0  ;;  %1027 = vmatprep.mubr.f32.mxu1 %v1451_v28  ;;  %v556_v40 = vmul.f32 %v983_v34, %v507_v9  ;;  %v571_v42 = vmul.f32 0.9, %v555_v29  ;;  %v610_v29 = vmul.f32 0.1, %v594_v16 }
 0x1c0   :  { %v569_v39 = vmul.f32 0.9, %v553_v32  ;;  %v554_v41 = vmul.f32 %v497_v62, %v358_v35  ;;  %v611_v35 = vmul.f32 0.1, %v595_v21 }
 0x1c1   :  { %v572_v49 = vmul.f32 0.9, %v556_v40  ;;  %v1475_v54 = vadd.f32 %v603_v43, %v571_v42 }
 0x1c2   :  { %v1463_v45 = vadd.f32 %v601_v33, %v569_v39  ;;  %v570_v46 = vmul.f32 0.9, %v554_v41  ;;  %1028 = vmatmul.mubr.f32.gmra.mrb[2].mxu1 %v1458_v38 }
 0x1c3   :  { %v1482_v0 = vadd.f32 %v604_v50, %v572_v49  ;;  %v790_v50 = vmul.f32 0.7768564, %v1440_v20 }
 0x1c4   :  { %v1469_v51 = vadd.f32 %v602_v36, %v570_v46  ;;  %v986_v52 = vpop.f32.mrb[8].mxu0  ;;  %1030 = vmatprep.mubr.f32.mxu1 %v1463_v45  ;;  %v596_v36 = vld [vmem:[%s1559_s4 + $0x78] sm:$0xff]  ;;  %s1201_s4 = smov [#allocation9]  }
 0x1c5   :  { %v559_v55 = vmul.f32 %v986_v52, %v522_v37  ;;  %v371_v56 = vpop.f32.mrb[9].mxu0  ;;  %v612_v41 = vmul.f32 0.1, %v596_v36  ;;  %v839_v52 = vld [vmem:[#allocation6 + $0x8] sm:$0xff]  ;;  %v797_v21 = vmul.f32 0.7768564, %v1482_v0 }
 0x1c6   :  { %v557_v59 = vmul.f32 %v512_v18, %v371_v56  ;;  %v987_v61 = vpop.f32.mrb[10].mxu0  ;;  %1031 = vmatmul.mubr.f32.gmra.mrb[4].mxu1 %v1469_v51  ;;  %v838_v56 = vld [vmem:[#allocation6] sm:$0xff]  ;;  %v795_v7 = vmul.f32 0.7768564, %v1469_v51  ;;  %v845_v51 = vld [vmem:[#allocation6 + $0x38] sm:$0xff]  ;;  %s891_s16 = sshll.u32 %s1201_s4, 4  ;;  %s892_s16 = int_to_ptr.vmem [resolvable:$true] %s891_s16 }
 0x1c7   :  { %v374_v62 = vpop.f32.mrb[11].mxu0  ;;  %1033 = vmatprep.mubr.f32.mxu1 %v1475_v54  ;;  %v560_v2 = vmul.f32 %v987_v61, %v527_v47  ;;  %v575_v5 = vmul.f32 0.9, %v559_v55  ;;  %v791_v47 = vmul.f32 0.7768564, %v1445_v24  ;;  %p1170_p11 = scmp.lt.s32.totalorder %s892_s16, %s892_s16 }
 0x1c8   :  { %v573_v1 = vmul.f32 0.9, %v557_v59  ;;  %v558_v3 = vmul.f32 %v517_v27, %v374_v62  ;;  %s1165_s18 = scalar_lea.vmem %s892_s16, 2048 }
 0x1c9   :  { %v576_v12 = vmul.f32 0.9, %v560_v2  ;;  %v1499_v17 = vadd.f32 %v607_v6, %v575_v5  ;;  %v792_v2 = vmul.f32 0.7768564, %v1451_v28  ;;  %v842_v28 = vld [vmem:[#allocation6 + $0x20] sm:$0xff]  ;;  %p1166_p10 = scmp.ne.s32.totalorder %s892_s16, %s1165_s18  ;;  %p1171_p12 = scmp.lt.s32.totalorder %s1165_s18, %s1165_s18 }
 0x1ca   :  { %v1487_v8 = vadd.f32 %v605_v60, %v573_v1  ;;  %v574_v9 = vmul.f32 0.9, %v558_v3  ;;  %1034 = vmatmul.mubr.f32.gmra.mrb[6].mxu1 %v1482_v0  ;;  %v793_v60 = vmul.f32 0.7768564, %v1458_v38  ;;  %v841_v1 = vld [vmem:[#allocation6 + $0x18] sm:$0xff]  ;;  %v843_v38 = vld [vmem:[#allocation6 + $0x28] sm:$0xff] }
 0x1cb   :  { %v1506_v30 = vadd.f32 %v608_v13, %v576_v12  ;;  %v794_v12 = vmul.f32 0.7768564, %v1463_v45  ;;  %v844_v45 = vld [vmem:[#allocation6 + $0x30] sm:$0xff]  ;;  %v847_v0 = vld [vmem:[#allocation6 + $0x48] sm:$0xff]  ;;  %p1172_p13 = por %p1171_p12, %p1170_p11 }
 0x1cc   :  { %v1493_v14 = vadd.f32 %v606_v63, %v574_v9  ;;  %v990_v15 = vpop.f32.mrb[12].mxu0  ;;  %1036 = vmatprep.mubr.f32.mxu1 %v1487_v8 }
 0x1cd   :  { %v563_v18 = vmul.f32 %v990_v15, %v542_v11  ;;  %v387_v19 = vpop.f32.mrb[13].mxu0  ;;  %p1173_p0 = pnand %p1172_p13, %p1166_p10 }
 0x1ce   :  { %v561_v22 = vmul.f32 %v532_v57, %v387_v19  ;;  %v991_v25 = vpop.f32.mrb[14].mxu0  ;;  %1037 = vmatmul.mubr.f32.gmra.mrb[8].mxu1 %v1493_v14 }
 0x1cf   :  { %v390_v27 = vpop.f32.mrb[15].mxu0  ;;  %1039 = vmatprep.mubr.f32.mxu1 %v1499_v17  ;;  %v564_v32 = vmul.f32 %v991_v25, %v547_v26  ;;  %v579_v34 = vmul.f32 0.9, %v563_v18  ;;  %v796_v26 = vmul.f32 0.7768564, %v1475_v54  ;;  %v846_v54 = vld [vmem:[#allocation6 + $0x40] sm:$0xff] }
 0x1d0   :  { %v577_v31 = vmul.f32 0.9, %v561_v22  ;;  %v562_v33 = vmul.f32 %v537_v4, %v390_v27  ;;  %v840_v4 = vld [vmem:[#allocation6 + $0x10] sm:$0xff] }
 0x1d1   :  { %v580_v40 = vmul.f32 0.9, %v564_v32  ;;  %v1517_v43 = vadd.f32 %v611_v35, %v579_v34  ;;  %v799_v34 = vmul.f32 0.7768564, %v1493_v14  ;;  %v849_v14 = vld [vmem:[#allocation6 + $0x58] sm:$0xff] }
 0x1d2   :  { %v1511_v37 = vadd.f32 %v609_v23, %v577_v31  ;;  %v578_v39 = vmul.f32 0.9, %v562_v33  ;;  %1040 = vmatmul.mubr.f32.gmra.mrb[10].mxu1 %v1506_v30 }
 0x1d3   :  { %v1521_v44 = vadd.f32 %v612_v41, %v580_v40  ;;  %v798_v40 = vmul.f32 0.7768564, %v1487_v8  ;;  %v848_v8 = vld [vmem:[#allocation6 + $0x50] sm:$0xff] }
 0x1d4   :  { %v1514_v42 = vadd.f32 %v610_v29, %v578_v39  ;;  %1042 = vmatprep.mubr.f32.mxu1 %v1511_v37 }
 0x1d6   :  { %1043 = vmatmul.mubr.f32.gmra.mrb[12].mxu1 %v1514_v42 }
 0x1d7   :  { %1045 = vmatprep.mubr.f32.mxu1 %v1517_v43 }
 0x1da   :  { %1046 = vmatmul.mubr.f32.gmra.mrb[14].mxu1 %v1521_v44 }
 0x291   :  { %v1026_v46 = vpop.f32.mrb[0].mxu1 }
 0x292   :  { %v807_v48 = vmul.f32 0.22314355, %v1026_v46  ;;  %v711_v49 = vpop.f32.mrb[1].mxu1 }
 0x293   :  { %v806_v53 = vmul.f32 0.22314355, %v711_v49 }
 0x294   :  { %v823_v55 = vadd.f32 %v807_v48, %v791_v47 }
 0x295   :  { %v822_v57 = vadd.f32 %v806_v53, %v790_v50  ;;  %v1029_v58 = vpop.f32.mrb[2].mxu1  ;;  %v801_v50 = vmul.f32 0.7768564, %v1506_v30  ;;  %v851_v30 = vld [vmem:[#allocation6 + $0x68] sm:$0xff] }
 0x296   :  { %v855_v59 = vadd.f32 %v839_v52, %v823_v55  ;;  %v809_v61 = vmul.f32 0.22314355, %v1029_v58  ;;  %v721_v62 = vpop.f32.mrb[3].mxu1 }
 0x297   :  { %v854_v63 = vadd.f32 %v838_v56, %v822_v57  ;;  %v808_v24 = vmul.f32 0.22314355, %v721_v62  ;;  %v800_v56 = vmul.f32 0.7768564, %v1499_v17  ;;  %v803_v62 = vmul.f32 0.7768564, %v1514_v42 }
 0x298   :  { %871 = vst [vmem:[#allocation9 + $0x8] sm:$0xff] %v855_v59  ;;  %v825_v3 = vadd.f32 %v809_v61, %v793_v60  ;;  %v850_v17 = vld [vmem:[#allocation6 + $0x60] sm:$0xff]  ;;  %v853_v42 = vld [vmem:[#allocation6 + $0x78] sm:$0xff] }
 0x299   :  { %870 = vst [vmem:[#allocation9] sm:$0xff] %v854_v63  ;;  %v824_v20 = vadd.f32 %v808_v24, %v792_v2  ;;  %v1032_v5 = vpop.f32.mrb[4].mxu1  ;;  %v802_v24 = vmul.f32 0.7768564, %v1511_v37  ;;  %v852_v37 = vld [vmem:[#allocation6 + $0x70] sm:$0xff] }
 0x29a   :  { %v857_v6 = vadd.f32 %v841_v1, %v825_v3  ;;  %v811_v9 = vmul.f32 0.22314355, %v1032_v5  ;;  %v731_v10 = vpop.f32.mrb[5].mxu1 }
 0x29b   :  { %v856_v11 = vadd.f32 %v840_v4, %v824_v20  ;;  %v810_v13 = vmul.f32 0.22314355, %v731_v10 }
 0x29c   :  { %873 = vst [vmem:[#allocation9 + $0x18] sm:$0xff] %v857_v6  ;;  %v827_v15 = vadd.f32 %v811_v9, %v795_v7  ;;  %v805_v7 = vmul.f32 0.7768564, %v1521_v44 }
 0x29d   :  { %872 = vst [vmem:[#allocation9 + $0x10] sm:$0xff] %v856_v11  ;;  %v826_v16 = vadd.f32 %v810_v13, %v794_v12  ;;  %v1035_v18 = vpop.f32.mrb[6].mxu1 }
 0x29e   :  { %v859_v19 = vadd.f32 %v843_v38, %v827_v15  ;;  %v813_v22 = vmul.f32 0.22314355, %v1035_v18  ;;  %v741_v23 = vpop.f32.mrb[7].mxu1  ;;  %v804_v38 = vmul.f32 0.7768564, %v1517_v43 }
 0x29f   :  { %v858_v25 = vadd.f32 %v842_v28, %v826_v16  ;;  %v812_v27 = vmul.f32 0.22314355, %v741_v23 }
 0x2a0   :  { %875 = vst [vmem:[#allocation9 + $0x28] sm:$0xff] %v859_v19  ;;  %v829_v29 = vadd.f32 %v813_v22, %v797_v21 }
 0x2a1   :  { %874 = vst [vmem:[#allocation9 + $0x20] sm:$0xff] %v858_v25  ;;  %v828_v31 = vadd.f32 %v812_v27, %v796_v26  ;;  %v1038_v32 = vpop.f32.mrb[8].mxu1 }
 0x2a2   :  { %v861_v33 = vadd.f32 %v845_v51, %v829_v29  ;;  %v815_v35 = vmul.f32 0.22314355, %v1038_v32  ;;  %v751_v36 = vpop.f32.mrb[9].mxu1 }
 0x2a3   :  { %v860_v39 = vadd.f32 %v844_v45, %v828_v31  ;;  %v814_v41 = vmul.f32 0.22314355, %v751_v36 }
 0x2a4   :  { %877 = vst [vmem:[#allocation9 + $0x38] sm:$0xff] %v861_v33  ;;  %v831_v46 = vadd.f32 %v815_v35, %v799_v34 }
 0x2a5   :  { %876 = vst [vmem:[#allocation9 + $0x30] sm:$0xff] %v860_v39  ;;  %v830_v47 = vadd.f32 %v814_v41, %v798_v40  ;;  %v1041_v48 = vpop.f32.mrb[10].mxu1 }
 0x2a6   :  { %v863_v49 = vadd.f32 %v847_v0, %v831_v46  ;;  %v817_v52 = vmul.f32 0.22314355, %v1041_v48  ;;  %v761_v53 = vpop.f32.mrb[11].mxu1 }
 0x2a7   :  { %v862_v55 = vadd.f32 %v846_v54, %v830_v47  ;;  %v816_v57 = vmul.f32 0.22314355, %v761_v53 }
 0x2a8   :  { %879 = vst [vmem:[#allocation9 + $0x48] sm:$0xff] %v863_v49  ;;  %v833_v58 = vadd.f32 %v817_v52, %v801_v50 }
 0x2a9   :  { %878 = vst [vmem:[#allocation9 + $0x40] sm:$0xff] %v862_v55  ;;  %v832_v59 = vadd.f32 %v816_v57, %v800_v56  ;;  %v1044_v60 = vpop.f32.mrb[12].mxu1 }
 0x2aa   :  { %v865_v61 = vadd.f32 %v849_v14, %v833_v58  ;;  %v819_v63 = vmul.f32 0.22314355, %v1044_v60  ;;  %v771_v1 = vpop.f32.mrb[13].mxu1 }
 0x2ab   :  { %v864_v2 = vadd.f32 %v848_v8, %v832_v59  ;;  %v818_v3 = vmul.f32 0.22314355, %v771_v1 }
 0x2ac   :  { %881 = vst [vmem:[#allocation9 + $0x58] sm:$0xff] %v865_v61  ;;  %v835_v4 = vadd.f32 %v819_v63, %v803_v62 }
 0x2ad   :  { %880 = vst [vmem:[#allocation9 + $0x50] sm:$0xff] %v864_v2  ;;  %v834_v20 = vadd.f32 %v818_v3, %v802_v24  ;;  %v1047_v5 = vpop.f32.mrb[14].mxu1 }
 0x2ae   :  { %v867_v6 = vadd.f32 %v851_v30, %v835_v4  ;;  %v821_v9 = vmul.f32 0.22314355, %v1047_v5  ;;  %v781_v10 = vpop.f32.mrb[15].mxu1 }
 0x2af   :  { %v866_v11 = vadd.f32 %v850_v17, %v834_v20  ;;  %v820_v12 = vmul.f32 0.22314355, %v781_v10 }
 0x2b0   :  { %883 = vst [vmem:[#allocation9 + $0x68] sm:$0xff] %v867_v6  ;;  %v837_v13 = vadd.f32 %v821_v9, %v805_v7 }
 0x2b1   :  { %882 = vst [vmem:[#allocation9 + $0x60] sm:$0xff] %v866_v11  ;;  %v836_v15 = vadd.f32 %v820_v12, %v804_v38 }
 0x2b2   :  { %v869_v28 = vadd.f32 %v853_v42, %v837_v13 }
 0x2b3   :  { %v868_v16 = vadd.f32 %v852_v37, %v836_v15 }
 0x2b4   :  { %885 = vst [vmem:[#allocation9 + $0x78] sm:$0xff] %v869_v28 }
 0x2b5   :  { %884 = vst [vmem:[#allocation9 + $0x70] sm:$0xff] %v868_v16 }
 0x2b6   :  { %1176 = shalt.err (!%p1173_p0)
}
 0x2b7   :  { %s1177_s21 = scalar_lea.hbm %s1562_s7, 2048 }
 0x2b8   :  { %p1178_p1 = scmp.ne.s32.totalorder %s1562_s7, %s1177_s21  ;;  %p1181_p2 = scmp.lt.u32.totalorder %s1177_s21, %s1562_s7 }
 0x2ba   :  { %p1183_p3 = pnand %p1181_p2, %p1178_p1 }
 0x2bc   :  { %1186 = shalt.err (!%p1183_p3)
}
 0x2bd   :  { %897 = dma.vmem_to_hbm [thread:$0]  %s892_s16, 2048, %s1562_s7, [#allocation5], %s1194_s11, %s1194_s11, %s1195_s12  }
 0x2be   :  { %1191 = dma.done.wait [#allocation5], 2048  }
 0x2bf   :  { %1192 = vsyncadd [#allocation5], 4294965248 }
 0x2c0   :  { %901 = vsyncpa [#allocation4], 1 }
 0x2c1   :  { %902 = vsyncpa [#allocation7], 1 }
 0x2c2   :  { %903 = vsyncpa [#allocation5], 1 }

</bundles_post_ra>
